<compile_context>
chip_gen: v7x
topology: tpu7x:2x2x1
jax: 0.10.0
libtpu: 0.0.40
codegen_flags: <defaults>
</compile_context>

<pallas_src>
import math

import jax
import jax.numpy as jnp
from jax.experimental import pallas as pl
from jax.experimental.pallas import tpu as pltpu


def _round_up(x: int, m: int) -> int:
    return ((x + m - 1) // m) * m


def _swap_linear_kernel(x_ref, w_ref, b_ref, o_ref, acc_ref):
    k = pl.program_id(2)

    @pl.when(k == 0)
    def _():
        acc_ref[...] = jnp.zeros_like(acc_ref)

    acc_ref[...] += jnp.dot(
        x_ref[...], w_ref[...], preferred_element_type=jnp.float32
    )

    @pl.when(k == pl.num_programs(2) - 1)
    def _():
        o_ref[...] = (acc_ref[...] + b_ref[...].astype(jnp.float32)).astype(
            o_ref.dtype
        )


def _matmul_bias(x2, wt, b, *, tm, tn, tk):
    M, K = x2.shape
    N = wt.shape[1]
    grid = (M // tm, N // tn, K // tk)
    return pl.pallas_call(
        _swap_linear_kernel,
        out_shape=jax.ShapeDtypeStruct((M, N), x2.dtype),
        grid=grid,
        in_specs=[
            pl.BlockSpec((tm, tk), lambda i, j, k: (i, k)),
            pl.BlockSpec((tk, tn), lambda i, j, k: (k, j)),
            pl.BlockSpec((1, tn), lambda i, j, k: (0, j)),
        ],
        out_specs=pl.BlockSpec((tm, tn), lambda i, j, k: (i, j)),
        scratch_shapes=[pltpu.VMEM((tm, tn), jnp.float32)],
        compiler_params=pltpu.CompilerParams(
            dimension_semantics=("parallel", "parallel", "arbitrary"),
        ),
    )(x2, wt, b)


def swap_linear(x: jax.Array, weight: jax.Array, bias: jax.Array, dim: int = -1):
    """Pallas SwapLinear forward: nn.Linear applied along axis `dim` of x."""
    ndim = x.ndim
    dim = dim % ndim
    out_features, in_features = weight.shape
    assert x.shape[dim] == in_features, "x.shape[dim] must equal in_features"

    # --- layout plumbing (outside the kernel): dim -> last, flatten to 2D ---
    xt = jnp.swapaxes(x, dim, ndim - 1)
    lead_shape = xt.shape[:-1]
    M = math.prod(lead_shape) if lead_shape else 1
    K, N = in_features, out_features
    x2 = xt.reshape(M, K)
    wt = weight.T  # (K, N)

    # --- pick lane-dense tiles and pad up to tile multiples -----------------
    tm = min(256, _round_up(M, 8))      # sublane axis: multiple of 8
    tn = min(256, _round_up(N, 128))    # lane axis: multiple of 128
    tk = min(512, _round_up(K, 128))    # lane axis of x block: multiple of 128
    Mp, Np, Kp = _round_up(M, tm), _round_up(N, tn), _round_up(K, tk)

    x2p = jnp.pad(x2, ((0, Mp - M), (0, Kp - K)))
    wtp = jnp.pad(wt, ((0, Kp - K), (0, Np - N))).astype(x2.dtype)
    bp = jnp.pad(bias, (0, Np - N)).reshape(1, Np).astype(x2.dtype)

    out2 = _matmul_bias(x2p, wtp, bp, tm=tm, tn=tn, tk=tk)
    out2 = out2[:M, :N]

    out = out2.reshape(lead_shape + (N,))
    return jnp.swapaxes(out, dim, ndim - 1)


def _reference(x, weight, bias, dim=-1):
    xt = jnp.swapaxes(x, dim, x.ndim - 1)
    yt = (
        jnp.einsum(
            "...k,nk->...n",
            xt.astype(jnp.float32),
            weight.astype(jnp.float32),
        )
        + bias.astype(jnp.float32)
    )
    return jnp.swapaxes(yt.astype(x.dtype), dim, x.ndim - 1)


if __name__ == "__main__":
    key = jax.random.PRNGKey(0)
    k1, k2, k3, k4 = jax.random.split(key, 4)

    # x: (batch=2, channels=4, seq=8, hidden=32); SwapLinear over dim=1
    # (channels): in_features=4 -> out_features=16.
    batch, channels, seq, hidden = 2, 4, 8, 32
    in_features, out_features = channels, 16
    dim = 1

    x = jax.random.normal(k1, (batch, channels, seq, hidden), dtype=jnp.float32)
    w = jax.random.normal(k2, (out_features, in_features), dtype=jnp.float32) * 0.1
    b = jax.random.normal(k3, (out_features,), dtype=jnp.float32) * 0.1

    out = swap_linear(x, w, b, dim=dim)
    out = jax.block_until_ready(out)
    ref = _reference(x, w, b, dim=dim)
    assert out.shape == (batch, out_features, seq, hidden)
    assert jnp.allclose(out, ref, atol=1e-4, rtol=1e-4), "mismatch vs reference (dim=1)"

    # Also exercise the default dim=-1 path (plain Linear over the last axis).
    w2 = jax.random.normal(k4, (24, hidden), dtype=jnp.float32) * 0.1
    b2 = jnp.zeros((24,), dtype=jnp.float32)
    out2 = jax.block_until_ready(swap_linear(x, w2, b2, dim=-1))
    ref2 = _reference(x, w2, b2, dim=-1)
    assert out2.shape == (batch, channels, seq, 24)
    assert jnp.allclose(out2, ref2, atol=1e-4, rtol=1e-4), "mismatch vs reference (dim=-1)"

    print("KERNEL_OK")
</pallas_src>

<mosaic_0001>
module attributes {stable_mosaic.version = 11 : i64} {
  func.func @_swap_linear_kernel(%arg0: i32, %arg1: i32, %arg2: i32, %arg3: memref<256x128xf32, #tpu.memory_space<vmem>>, %arg4: memref<128x128xf32, #tpu.memory_space<vmem>>, %arg5: memref<1x128xf32, #tpu.memory_space<vmem>>, %arg6: memref<256x128xf32, #tpu.memory_space<vmem>>, %arg7: memref<256x128xf32, #tpu.memory_space<vmem>>) attributes {dimension_semantics = [#tpu.dimension_semantics<parallel>, #tpu.dimension_semantics<parallel>, #tpu.dimension_semantics<arbitrary>], iteration_bounds = array<i64: 2, 1, 1>, scalar_prefetch = 0 : i64, scratch_operands = 1 : i64, tpu.core_type = #tpu.core_type<tc>, window_params = [{transform_indices = @transform_0, window_bounds = array<i64: 256, 128>}, {transform_indices = @transform_1, window_bounds = array<i64: 128, 128>}, {transform_indices = @transform_2, window_bounds = array<i64: 1, 128>}, {transform_indices = @transform_3, window_bounds = array<i64: 256, 128>}]} {
    %c0_i32 = arith.constant 0 : i32
    %0 = arith.cmpi eq, %arg2, %c0_i32 : i32
    %1 = arith.extui %0 : i1 to i32
    %c0_i32_0 = arith.constant 0 : i32
    %2 = arith.cmpi ne, %1, %c0_i32_0 : i32
    scf.if %2 {
      %cst_10 = arith.constant 0.000000e+00 : f32
      %12 = vector.broadcast %cst_10 : f32 to vector<256x128xf32>
      %c0_11 = arith.constant 0 : index
      %c0_12 = arith.constant 0 : index
      %13 = vector.load %arg7[%c0_11, %c0_12] : memref<256x128xf32, #tpu.memory_space<vmem>>, vector<256x128xf32>
      tpu.vector_store %arg7[%c0_11, %c0_12], %12 {strides = array<i32>} : memref<256x128xf32, #tpu.memory_space<vmem>>, vector<256x128xf32>,
    } else {
    }
    %c0 = arith.constant 0 : index
    %c0_1 = arith.constant 0 : index
    %3 = vector.load %arg7[%c0, %c0_1] : memref<256x128xf32, #tpu.memory_space<vmem>>, vector<256x128xf32>
    %c0_2 = arith.constant 0 : index
    %c0_3 = arith.constant 0 : index
    %4 = vector.load %arg3[%c0_2, %c0_3] : memref<256x128xf32, #tpu.memory_space<vmem>>, vector<256x128xf32>
    %c0_4 = arith.constant 0 : index
    %c0_5 = arith.constant 0 : index
    %5 = vector.load %arg4[%c0_4, %c0_5] : memref<128x128xf32, #tpu.memory_space<vmem>>, vector<128x128xf32>
    %cst = arith.constant dense<0.000000e+00> : vector<256x128xf32>
    %6 = tpu.matmul %4, %5, %cst {dimension_numbers = #tpu.dot_dimension_numbers<[1], [0], [0], [1], [0, 0, 1, 1], [], []>} : vector<256x128xf32>, vector<128x128xf32>, vector<256x128xf32> -> vector<256x128xf32>
    %7 = arith.addf %3, %6 : vector<256x128xf32>
    %c0_6 = arith.constant 0 : index
    %c0_7 = arith.constant 0 : index
    %8 = vector.load %arg7[%c0_6, %c0_7] : memref<256x128xf32, #tpu.memory_space<vmem>>, vector<256x128xf32>
    tpu.vector_store %arg7[%c0_6, %c0_7], %7 {strides = array<i32>} : memref<256x128xf32, #tpu.memory_space<vmem>>, vector<256x128xf32>,
    %c0_i32_8 = arith.constant 0 : i32
    %9 = arith.cmpi eq, %arg2, %c0_i32_8 : i32
    %10 = arith.extui %9 : i1 to i32
    %c0_i32_9 = arith.constant 0 : i32
    %11 = arith.cmpi ne, %10, %c0_i32_9 : i32
    scf.if %11 {
      %c0_10 = arith.constant 0 : index
      %c0_11 = arith.constant 0 : index
      %12 = vector.load %arg7[%c0_10, %c0_11] : memref<256x128xf32, #tpu.memory_space<vmem>>, vector<256x128xf32>
      %c0_12 = arith.constant 0 : index
      %c0_13 = arith.constant 0 : index
      %13 = vector.load %arg5[%c0_12, %c0_13] : memref<1x128xf32, #tpu.memory_space<vmem>>, vector<1x128xf32>
      %14 = vector.broadcast %13 : vector<1x128xf32> to vector<256x128xf32>
      %15 = arith.addf %12, %14 : vector<256x128xf32>
      %c0_14 = arith.constant 0 : index
      %c0_15 = arith.constant 0 : index
      %16 = vector.load %arg6[%c0_14, %c0_15] : memref<256x128xf32, #tpu.memory_space<vmem>>, vector<256x128xf32>
      tpu.vector_store %arg6[%c0_14, %c0_15], %15 {strides = array<i32>} : memref<256x128xf32, #tpu.memory_space<vmem>>, vector<256x128xf32>,
    } else {
    }
    return
  }
  func.func @transform_0(%arg0: i32, %arg1: i32, %arg2: i32) -> (i32, i32) {
    %c0_i32 = arith.constant 0 : i32
    return %arg0, %arg2 : i32, i32
  }
  func.func @transform_1(%arg0: i32, %arg1: i32, %arg2: i32) -> (i32, i32) {
    %c0_i32 = arith.constant 0 : i32
    return %arg2, %arg1 : i32, i32
  }
  func.func @transform_2(%arg0: i32, %arg1: i32, %arg2: i32) -> (i32, i32) {
    %c0_i32 = arith.constant 0 : i32
    %c0_i32_0 = arith.constant 0 : i32
    return %c0_i32, %arg1 : i32, i32
  }
  func.func @transform_3(%arg0: i32, %arg1: i32, %arg2: i32) -> (i32, i32) {
    %c0_i32 = arith.constant 0 : i32
    return %arg0, %arg1 : i32, i32
  }
}

</mosaic_0001>

<bundles_post_ra>
// kernel: tpu_custom_call.1
= control target key start
LH: loop header
LB: loop body
LE: loop exit
PB: predicated region body
PF: predicated region fallthrough
CT: control target
= control target key end

     0   :  { %8 = vsyncpa [#allocation4], 0  ;;  %s1678_s0 = inlined_call_operand.hbm [shape: f32[512,128], index: 0, kind: input, shape index: {}]   ;;  %s1679_s1 = inlined_call_operand.hbm [shape: f32[128,128], index: 1, kind: input, shape index: {}]   ;;  %s1680_s2 = inlined_call_operand.vmem [shape: f32[1,128], index: 2, kind: input, shape index: {}]   ;;  %s1681_s3 = inlined_call_operand.hbm [shape: f32[512,128], index: 3, kind: output, shape index: {}]  }
   0x1   :  { %10 = vsyncpa [#allocation4 + $0x1], 0 }
   0x2   :  { %11 = vsyncpa [#allocation7], 0 }
   0x3   :  { %12 = vsyncpa [#allocation5], 0 }
   0x4   :  { %14 = vsyncpa [#allocation5 + $0x1], 0  ;;  %s1343_s12 = smov 0   ;;  %s1345_s13 = smov 0  }
   0x5   :  { %s1347_s14 = smov 0   ;;  %s1349_s15 = smov 0  }
   0x6   :  { %s1351_s16 = smov 0   ;;  %s1353_s17 = smov 0  }
   0x7 LB: > { %s896_s18 = sadd.s32 4294967295, %s1314_s17   ;;  %s897_s19 = sadd.s32 4294967294, %s1314_s17   ;;  %s1314_s17 = sphi %s1353_s17, %s20_s17   ;;  %s1310_s16 = sphi %s1351_s16, %s1705_s16   ;;  %s1306_s15 = sphi %s1349_s15, %s1704_s15   ;;  %s1302_s14 = sphi %s1347_s14, %s1703_s14   ;;  %s1298_s13 = sphi %s1345_s13, %s1702_s13   ;;  %s1294_s12 = sphi %s1343_s12, %s1701_s12  }
   0x8   : > { %p61_p0 = scmp.ne.s32.totalorder %s1298_s13, %s1294_s12  ;;  %p1377_p1 = scmp.eq.s32.totalorder %s896_s18, 0 }
   0x9   : > { %p1381_p2 = scmp.eq.s32.totalorder %s896_s18, 1  ;;  %p147_p3 = scmp.eq.s32.totalorder %s897_s19, 1 }
   0xa   : > { %s1686_s20 = scalar_select %p1377_p1, 1, 0 }
   0xb   : > { %s1687_s21 = scalar_select %p1381_p2, 1, 0 }
   0xc   : > { %p1387_p4 = por %p1377_p1, %p61_p0  ;;  %p898_p5 = scmp.ge.s32.totalorder %s1314_s17, 1 }
   0xd   : > { %p1392_p6 = por %p147_p3, %p61_p0  ;;  %p154_p7 = scmp.lt.s32.totalorder %s1314_s17, 3 }
   0xe   : > { %s1688_s22 = scalar_select %p1387_p4, 1, 0 }
   0xf   : > { %s1689_s23 = scalar_select %p1392_p6, 1, 0 }
  0x10   : > { %p1397_p8 = pnand %p898_p5, %p154_p7  ;;  %s1316_s25 = smov [#allocation6]  }
  0x11   : > { %s170_s26 = sshll.u32 %s1316_s25, 4  ;;  %s39_s28 = sadd.s32 1, %s1310_s16  ;;  %s171_s26 = int_to_ptr.vmem [resolvable:$true] %s170_s26 }
  0x12   : > { %s1690_s24 = scalar_select %p1397_p8, 1, 0 }
  0x13   : > { %p1101_p9 = pneg %p1397_p8  ;;  %s1170_s4 = scalar_lea.hbm %s1679_s1, 2048 }
  0x14   : > { %p1171_p12 = scmp.ne.s32.totalorder %s1679_s1, %s1170_s4  ;;  %p1177_p5 = scmp.lt.u32.totalorder %s1170_s4, %s1679_s1 }
  0x15   : > { %p1406_p11 = pnand %p1101_p9, %p1377_p1 }
  0x17   : > { %p1172_p13 = pneg %p1406_p11 }
  0x19   : > { %p1173_p0 = pnand %p1172_p13, %p1171_p12 }
  0x1b   : > { %p1174_p3 = pneg %p1173_p0 }
  0x1d   : > { %p1179_p7 = pnand %p1177_p5, %p1174_p3 }
  0x1f   : > { %1182 = shalt.err (!%p1179_p7)
}
  0x20   : > { %s1183_s9 = scalar_lea.vmem %s171_s26, 2048  ;;  %p1191_p1 = scmp.lt.s32.totalorder %s171_s26, %s171_s26 }
  0x21   : > { %p1184_p9 = scmp.ne.s32.totalorder %s171_s26, %s1183_s9  ;;  %p1192_p4 = scmp.lt.s32.totalorder %s1183_s9, %s1183_s9 }
  0x23   : > { %p1186_p10 = pnand %p1184_p9, %p1172_p13  ;;  %p1193_p8 = por %p1192_p4, %p1191_p1 }
  0x25   : > { %p1187_p6 = pneg %p1186_p10 }
  0x27   : > { %p1194_p2 = pnand %p1193_p8, %p1187_p6 }
  0x29   : > { %1197 = shalt.err (!%p1194_p2)
}
  0x2a   : > { %s1317_s10 = smov 128   ;;  %s1318_s11 = smov 8  }
  0x2b   : > { %1104 = dma.hbm_to_vmem [thread:$0]  (!%p1406_p11), %s1679_s1, 2048, %s171_s26, [#allocation7], %s1317_s10, %s1317_s10, %s1318_s11  }
  0x2c   : > { %p41_p1 = scmp.ge.s32.totalorder %s39_s28, 2  ;;  %s48_s25 = sadd.s32 1, %s1302_s14 }
  0x2d   : > { %p55_p2 = scmp.ne.s32.totalorder %s1302_s14, %s1298_s13  ;;  %p56_p4 = scmp.eq.s32.totalorder %s1314_s17, 0 }
  0x2e   : > { %s1707_s28 = smov (%p41_p1, %s39_s28), 0  ;;  %p1693_p8 = scmp.ne.s32.totalorder %s1687_s21, 0 }
  0x2f   : > { %p1436_p6 = por %p56_p4, %p55_p2  ;;  %s43_s30 = ssub.s32 %s1310_s16, %s1707_s28 }
  0x30   : > { %p1442_p10 = por %p1693_p8, %p55_p2  ;;  %p1114_p12 = scmp.lt.s32.totalorder %s1314_s17, 2 }
  0x31   : > { %p46_p11 = scmp.eq.s32.totalorder %s43_s30, 0  ;;  %s190_s26 = sand.u32 1, %s1302_s14  }
  0x32   : > { %s902_s4 = sshll.u32 %s190_s26, 8  ;;  %s915_s6 = sshll.u32 %s1310_s16, 12 }
  0x33   : > { %s1451_s5 = scalar_select %p46_p11, %s1302_s14, %s48_s25  }
  0x34   : > { %s1457_s9 = scalar_lea.hbm %s1678_s0, %s915_s6  ;;  %s194_s21 = scalar_lea.vmem [#allocation3], %s902_s4 }
  0x35   : > { %s202_s18 = sshll.u32 %s194_s21, 4  ;;  %p1463_p13 = pnand %p1114_p12, %p1436_p6  ;;  %s1459_s18 = int_to_ptr.vmem [resolvable:$true] %s202_s18 }
  0x36   : > { %s1467_s25 = scalar_lea.sflag [#allocation4], %s190_s26  ;;  %s1198_s30 = scalar_lea.hbm %s1457_s9, 4096 }
  0x37   : > { %p1199_p0 = scmp.ne.s32.totalorder %s1457_s9, %s1198_s30  ;;  %p1200_p3 = pneg %p1463_p13 }
  0x38   : > { %s1203_s29 = scalar_lea.hbm %s1678_s0, 8192  ;;  %p1204_p9 = scmp.lt.u32.totalorder %s1457_s9, %s1678_s0 }
  0x39   : > { %p1201_p5 = pnand %p1200_p3, %p1199_p0  ;;  %p1205_p1 = scmp.lt.u32.totalorder %s1203_s29, %s1198_s30 }
  0x3a   : > { %p1207_p4 = scmp.lt.u32.totalorder %s1198_s30, %s1457_s9 }
  0x3b   : > { %p1202_p7 = pneg %p1201_p5  ;;  %p1206_p2 = por %p1205_p1, %p1204_p9 }
  0x3d   : > { %p1208_p6 = por %p1207_p4, %p1206_p2 }
  0x3f   : > { %p1209_p8 = pnand %p1208_p6, %p1202_p7 }
  0x41   : > { %1212 = shalt.err (!%p1209_p8)
}
  0x42   : > { %s1213_s26 = scalar_lea.vmem %s1459_s18, 4096  ;;  %s1319_s21 = smov [#allocation3]  }
  0x43   : > { %p1214_p12 = scmp.ne.s32.totalorder %s1459_s18, %s1213_s26  ;;  %s1218_s4 = sshll.u32 %s1319_s21, 4  ;;  %s1219_s4 = int_to_ptr.vmem [resolvable:$false] %s1218_s4 }
  0x44   : > { %s1220_s6 = scalar_lea.vmem %s1219_s4, 8192  ;;  %p1221_p5 = scmp.lt.s32.totalorder %s1459_s18, %s1219_s4 }
  0x45   : > { %p1216_p11 = pnand %p1214_p12, %p1200_p3  ;;  %p1222_p9 = scmp.lt.s32.totalorder %s1220_s6, %s1213_s26 }
  0x47   : > { %p1217_p0 = pneg %p1216_p11  ;;  %p1223_p1 = por %p1222_p9, %p1221_p5 }
  0x49   : > { %p1224_p2 = pnand %p1223_p1, %p1217_p0 }
  0x4b   : > { %1227 = shalt.err (!%p1224_p2)
}
  0x4c   : > { %1108 = dma.hbm_to_vmem [thread:$0]  (!%p1463_p13), %s1457_s9, 4096, %s1459_s18, %s1467_s25, %s1317_s10, %s1317_s10, %s1318_s11  }
  0x4d   : > { %p1696_p3 = scmp.ne.s32.totalorder %s1690_s24, 0 }
  0x4e   : > { %s1501_s30 = sand.u32 (!%p1696_p3), 1, %s1298_s13   ;;  %p1697_p7 = scmp.ne.s32.totalorder (!%p1696_p3), %s1688_s22, 0 }
  0x4f   : > { %214 = sbr.rel (%p1696_p3) target bundleno = 383 (0x17f), region = 32  ;;  %s906_s29 = sshll.u32 (!%p1696_p3), %s1501_s30, 8 }
  0x50   : > { %s217_s7 = scalar_lea.sflag (!%p1696_p3), [#allocation4], %s1501_s30  ;;  %s1507_s19 = scalar_lea.vmem (!%p1696_p3), [#allocation3], %s906_s29 }
  0x56   : > { %1281 = dma.done.wait (%p1697_p7), %s217_s7, 4096  }
  0x57   : > { %1283 = vsyncadd (%p1697_p7), %s217_s7, 4294963200  ;;  %p1698_p13 = scmp.ne.s32.totalorder %s1686_s20, 0 }
  0x59   : > { %1285 = dma.done.wait (%p1698_p13), [#allocation7], 2048  }
  0x5a   : > { %1287 = vsyncadd (%p1698_p13), [#allocation7], 4294965248  ;;  %v356_v0 = vld [vmem:[#allocation6] sm:$0xff]  ;;  %v357_v1 = vld [vmem:[#allocation6 + $0x8] sm:$0xff]  ;;  %s1560_s24 = scalar_lea.vmem [#allocation8], %s906_s29  ;;  %s916_s10 = sshll.u32 %s1306_s15, 12 }
  0x5b   : > { %v358_v2 = vld [vmem:[#allocation6 + $0x10] sm:$0xff]  ;;  %v1045_v3 = vpack.c.bf16 %v357_v1, %v356_v0  ;;  %v359_v4 = vld [vmem:[#allocation6 + $0x18] sm:$0xff]  ;;  %v360_v6 = vld [vmem:[#allocation6 + $0x20] sm:$0xff]  ;;  %s782_s11 = sshll.u32 %s1560_s24, 4  ;;  %s1621_s18 = scalar_lea.hbm %s1681_s3, %s916_s10  ;;  %s1623_s11 = int_to_ptr.vmem [resolvable:$true] %s782_s11 }
  0x5c   : > { %v1049_v5 = vpack.c.bf16 %v359_v4, %v358_v2  ;;  %v361_v7 = vld [vmem:[#allocation6 + $0x28] sm:$0xff]  ;;  %v324_v9 = vld [vmem:[%s1507_s19] sm:$0xff]  ;;  %v362_v11 = vld [vmem:[#allocation6 + $0x30] sm:$0xff]  ;;  %s768_s25 = scalar_lea.sflag [#allocation5], %s1501_s30  ;;  %s1228_s8 = scalar_lea.vmem %s1623_s11, 4096 }
  0x5d   : > { %1046 = vmatprep.subr.bf16.mxu0 %v1045_v3  ;;  %1077 = vmatprep.subr.bf16.mxu1 %v1045_v3  ;;  %v1053_v8 = vpack.c.bf16 %v361_v7, %v360_v6  ;;  %v340_v10 = vld [vmem:[%s1507_s19 + $0x80] sm:$0xff]  ;;  %v363_v12 = vld [vmem:[#allocation6 + $0x38] sm:$0xff]  ;;  %v365_v15 = vld [vmem:[#allocation6 + $0x48] sm:$0xff]  ;;  %p1229_p4 = scmp.ne.s32.totalorder %s1623_s11, %s1228_s8  ;;  %s1320_s26 = smov [#allocation8]  }
  0x5e   : > { %1048 = vmatpush3.bf16.msra.mxu0 %v1045_v3  ;;  %1085 = vmatpush3.bf16.msra.mxu1 %v1045_v3  ;;  %v1057_v13 = vpack.c.bf16 %v363_v12, %v362_v11  ;;  %v364_v14 = vld [vmem:[#allocation6 + $0x40] sm:$0xff]  ;;  %v366_v17 = vld [vmem:[#allocation6 + $0x50] sm:$0xff]  ;;  %v367_v18 = vld [vmem:[#allocation6 + $0x58] sm:$0xff]  ;;  %s1232_s21 = sshll.u32 %s1320_s26, 4  ;;  %s1233_s21 = int_to_ptr.vmem [resolvable:$false] %s1232_s21 }
  0x5f   : > { %1050 = vmatprep.subr.bf16.mxu0 %v1049_v5  ;;  %1078 = vmatprep.subr.bf16.mxu1 %v1049_v5  ;;  %v1061_v16 = vpack.c.bf16 %v365_v15, %v364_v14  ;;  %v1065_v19 = vpack.c.bf16 %v367_v18, %v366_v17  ;;  %v368_v20 = vld [vmem:[#allocation6 + $0x60] sm:$0xff]  ;;  %v369_v21 = vld [vmem:[#allocation6 + $0x68] sm:$0xff]  ;;  %v370_v23 = vld [vmem:[#allocation6 + $0x70] sm:$0xff]  ;;  %p1230_p6 = pnand %p1229_p4, %p1442_p10  ;;  %s1234_s4 = scalar_lea.vmem %s1233_s21, 8192 }
  0x60   : > { %997 = vmatprep.mubr.f32.mxu0 %v324_v9  ;;  %1021 = vmatprep.mubr.f32.mxu1 %v340_v10  ;;  %v1069_v22 = vpack.c.bf16 %v369_v21, %v368_v20  ;;  %v371_v24 = vld [vmem:[#allocation6 + $0x78] sm:$0xff]  ;;  %v325_v26 = vld [vmem:[%s1507_s19 + $0x8] sm:$0xff]  ;;  %v326_v28 = vld [vmem:[%s1507_s19 + $0x10] sm:$0xff]  ;;  %p1235_p12 = scmp.lt.s32.totalorder %s1623_s11, %s1233_s21  ;;  %p1236_p11 = scmp.lt.s32.totalorder %s1234_s4, %s1228_s8 }
  0x61   : > { %v1073_v25 = vpack.c.bf16 %v371_v24, %v370_v23  ;;  %v341_v27 = vld [vmem:[%s1507_s19 + $0x88] sm:$0xff]  ;;  %v342_v29 = vld [vmem:[%s1507_s19 + $0x90] sm:$0xff]  ;;  %v327_v30 = vld [vmem:[%s1507_s19 + $0x18] sm:$0xff]  ;;  %p1231_p8 = pneg %p1230_p6 }
  0x62   : > { %1052 = vmatpush3.bf16.msra.mxu0 %v1049_v5  ;;  %1086 = vmatpush3.bf16.msra.mxu1 %v1049_v5  ;;  %v343_v31 = vld [vmem:[%s1507_s19 + $0x98] sm:$0xff]  ;;  %v328_v32 = vld [vmem:[%s1507_s19 + $0x20] sm:$0xff]  ;;  %v329_v34 = vld [vmem:[%s1507_s19 + $0x28] sm:$0xff]  ;;  %p1237_p0 = por %p1236_p11, %p1235_p12 }
  0x63   : > { %1054 = vmatprep.subr.bf16.mxu0 %v1053_v8  ;;  %1079 = vmatprep.subr.bf16.mxu1 %v1053_v8  ;;  %v344_v33 = vld [vmem:[%s1507_s19 + $0xa0] sm:$0xff]  ;;  %v345_v35 = vld [vmem:[%s1507_s19 + $0xa8] sm:$0xff]  ;;  %v330_v36 = vld [vmem:[%s1507_s19 + $0x30] sm:$0xff] }
  0x64   : > { %v346_v37 = vld [vmem:[%s1507_s19 + $0xb0] sm:$0xff]  ;;  %v331_v38 = vld [vmem:[%s1507_s19 + $0x38] sm:$0xff]  ;;  %v332_v40 = vld [vmem:[%s1507_s19 + $0x40] sm:$0xff]  ;;  %p1238_p5 = pnand %p1237_p0, %p1231_p8 }
  0x65   : > { %v347_v39 = vld [vmem:[%s1507_s19 + $0xb8] sm:$0xff]  ;;  %v348_v41 = vld [vmem:[%s1507_s19 + $0xc0] sm:$0xff]  ;;  %v333_v42 = vld [vmem:[%s1507_s19 + $0x48] sm:$0xff] }
  0x66   : > { %1056 = vmatpush3.bf16.msra.mxu0 %v1053_v8  ;;  %1087 = vmatpush3.bf16.msra.mxu1 %v1053_v8  ;;  %v349_v43 = vld [vmem:[%s1507_s19 + $0xc8] sm:$0xff]  ;;  %v334_v44 = vld [vmem:[%s1507_s19 + $0x50] sm:$0xff]  ;;  %v335_v46 = vld [vmem:[%s1507_s19 + $0x58] sm:$0xff] }
  0x67   : > { %1058 = vmatprep.subr.bf16.mxu0 %v1057_v13  ;;  %1080 = vmatprep.subr.bf16.mxu1 %v1057_v13  ;;  %v350_v45 = vld [vmem:[%s1507_s19 + $0xd0] sm:$0xff]  ;;  %v351_v47 = vld [vmem:[%s1507_s19 + $0xd8] sm:$0xff]  ;;  %v336_v48 = vld [vmem:[%s1507_s19 + $0x60] sm:$0xff] }
  0x68   : > { %v352_v49 = vld [vmem:[%s1507_s19 + $0xe0] sm:$0xff]  ;;  %v337_v50 = vld [vmem:[%s1507_s19 + $0x68] sm:$0xff]  ;;  %v338_v52 = vld [vmem:[%s1507_s19 + $0x70] sm:$0xff] }
  0x69   : > { %v353_v51 = vld [vmem:[%s1507_s19 + $0xe8] sm:$0xff]  ;;  %v354_v53 = vld [vmem:[%s1507_s19 + $0xf0] sm:$0xff]  ;;  %v339_v54 = vld [vmem:[%s1507_s19 + $0x78] sm:$0xff] }
  0x6a   : > { %1060 = vmatpush3.bf16.msra.mxu0 %v1057_v13  ;;  %1088 = vmatpush3.bf16.msra.mxu1 %v1057_v13  ;;  %v355_v55 = vld [vmem:[%s1507_s19 + $0xf8] sm:$0xff]  ;;  %v1552_v56 = vld [vmem:[%s1680_s2] ss:$0 sm:$0xff] }
  0x6b   : > { %1062 = vmatprep.subr.bf16.mxu0 %v1061_v16  ;;  %1081 = vmatprep.subr.bf16.mxu1 %v1061_v16 }
  0x6e   : > { %1064 = vmatpush3.bf16.msra.mxu0 %v1061_v16  ;;  %1089 = vmatpush3.bf16.msra.mxu1 %v1061_v16 }
  0x6f   : > { %1066 = vmatprep.subr.bf16.mxu0 %v1065_v19  ;;  %1082 = vmatprep.subr.bf16.mxu1 %v1065_v19 }
  0x72   : > { %1068 = vmatpush3.bf16.msra.mxu0 %v1065_v19  ;;  %1090 = vmatpush3.bf16.msra.mxu1 %v1065_v19 }
  0x73   : > { %1070 = vmatprep.subr.bf16.mxu0 %v1069_v22  ;;  %1083 = vmatprep.subr.bf16.mxu1 %v1069_v22 }
  0x76   : > { %1072 = vmatpush3.bf16.msra.mxu0 %v1069_v22  ;;  %1091 = vmatpush3.bf16.msra.mxu1 %v1069_v22 }
  0x77   : > { %1074 = vmatprep.subr.bf16.mxu0 %v1073_v25  ;;  %1084 = vmatprep.subr.bf16.mxu1 %v1073_v25 }
  0x7a   : > { %1076 = vmatpush3.bf16.msra.mxu0 %v1073_v25  ;;  %1092 = vmatpush3.bf16.msra.mxu1 %v1073_v25 }
  0x7d   : > { %998 = vmatmul.mubr.f32.vlgmr.msra.gmra.mrb[0].mxu0 %v325_v26  ;;  %1022 = vmatmul.mubr.f32.vlgmr.msra.gmra.mrb[0].mxu1 %v341_v27 }
  0x7e   : > { %1000 = vmatprep.mubr.f32.mxu0 %v326_v28  ;;  %1024 = vmatprep.mubr.f32.mxu1 %v342_v29 }
  0x81   : > { %1001 = vmatmul.mubr.f32.gmra.mrb[2].mxu0 %v327_v30  ;;  %1025 = vmatmul.mubr.f32.gmra.mrb[2].mxu1 %v343_v31 }
  0x82   : > { %1003 = vmatprep.mubr.f32.mxu0 %v328_v32  ;;  %1027 = vmatprep.mubr.f32.mxu1 %v344_v33 }
  0x85   : > { %1004 = vmatmul.mubr.f32.gmra.mrb[4].mxu0 %v329_v34  ;;  %1028 = vmatmul.mubr.f32.gmra.mrb[4].mxu1 %v345_v35 }
  0x86   : > { %1006 = vmatprep.mubr.f32.mxu0 %v330_v36  ;;  %1030 = vmatprep.mubr.f32.mxu1 %v346_v37 }
  0x89   : > { %1007 = vmatmul.mubr.f32.gmra.mrb[6].mxu0 %v331_v38  ;;  %1031 = vmatmul.mubr.f32.gmra.mrb[6].mxu1 %v347_v39 }
  0x8a   : > { %1009 = vmatprep.mubr.f32.mxu0 %v332_v40  ;;  %1033 = vmatprep.mubr.f32.mxu1 %v348_v41 }
  0x8d   : > { %1010 = vmatmul.mubr.f32.gmra.mrb[8].mxu0 %v333_v42  ;;  %1034 = vmatmul.mubr.f32.gmra.mrb[8].mxu1 %v349_v43 }
  0x8e   : > { %1012 = vmatprep.mubr.f32.mxu0 %v334_v44  ;;  %1036 = vmatprep.mubr.f32.mxu1 %v350_v45 }
  0x91   : > { %1013 = vmatmul.mubr.f32.gmra.mrb[10].mxu0 %v335_v46  ;;  %1037 = vmatmul.mubr.f32.gmra.mrb[10].mxu1 %v351_v47 }
  0x92   : > { %1015 = vmatprep.mubr.f32.mxu0 %v336_v48  ;;  %1039 = vmatprep.mubr.f32.mxu1 %v352_v49 }
  0x95   : > { %1016 = vmatmul.mubr.f32.gmra.mrb[12].mxu0 %v337_v50  ;;  %1040 = vmatmul.mubr.f32.gmra.mrb[12].mxu1 %v353_v51 }
  0x96   : > { %1018 = vmatprep.mubr.f32.mxu0 %v338_v52  ;;  %1042 = vmatprep.mubr.f32.mxu1 %v354_v53 }
  0x99   : > { %1019 = vmatmul.mubr.f32.gmra.mrb[14].mxu0 %v339_v54  ;;  %1043 = vmatmul.mubr.f32.gmra.mrb[14].mxu1 %v355_v55 }
 0x150   : > { %v999_v57 = vpop.f32.mrb[0].mxu0  ;;  %v1023_v58 = vpop.f32.mrb[0].mxu1 }
 0x151   : > { %v704_v59 = vadd.f32 %v999_v57, %v1552_v56  ;;  %v720_v60 = vadd.f32 %v1023_v58, %v1552_v56  ;;  %v438_v61 = vpop.f32.mrb[1].mxu0  ;;  %v518_v62 = vpop.f32.mrb[1].mxu1 }
 0x152   : > { %v703_v63 = vadd.f32 %v1552_v56, %v438_v61  ;;  %v719_v0 = vadd.f32 %v1552_v56, %v518_v62 }
 0x153   : > { %736 = vst [vmem:[%s1560_s24 + $0x8] sm:$0xff] %v704_v59  ;;  %752 = vst [vmem:[%s1560_s24 + $0x88] sm:$0xff] %v720_v60 }
 0x154   : > { %735 = vst [vmem:[%s1560_s24] sm:$0xff] %v703_v63  ;;  %751 = vst [vmem:[%s1560_s24 + $0x80] sm:$0xff] %v719_v0  ;;  %v1002_v1 = vpop.f32.mrb[2].mxu0  ;;  %v1026_v2 = vpop.f32.mrb[2].mxu1 }
 0x155   : > { %v706_v3 = vadd.f32 %v1002_v1, %v1552_v56  ;;  %v722_v4 = vadd.f32 %v1026_v2, %v1552_v56  ;;  %v448_v5 = vpop.f32.mrb[3].mxu0  ;;  %v528_v6 = vpop.f32.mrb[3].mxu1 }
 0x156   : > { %v705_v7 = vadd.f32 %v1552_v56, %v448_v5  ;;  %v721_v8 = vadd.f32 %v1552_v56, %v528_v6 }
 0x157   : > { %738 = vst [vmem:[%s1560_s24 + $0x18] sm:$0xff] %v706_v3  ;;  %754 = vst [vmem:[%s1560_s24 + $0x98] sm:$0xff] %v722_v4 }
 0x158   : > { %737 = vst [vmem:[%s1560_s24 + $0x10] sm:$0xff] %v705_v7  ;;  %753 = vst [vmem:[%s1560_s24 + $0x90] sm:$0xff] %v721_v8  ;;  %v1005_v9 = vpop.f32.mrb[4].mxu0  ;;  %v1029_v10 = vpop.f32.mrb[4].mxu1 }
 0x159   : > { %v708_v11 = vadd.f32 %v1005_v9, %v1552_v56  ;;  %v724_v12 = vadd.f32 %v1029_v10, %v1552_v56  ;;  %v458_v13 = vpop.f32.mrb[5].mxu0  ;;  %v538_v14 = vpop.f32.mrb[5].mxu1 }
 0x15a   : > { %v707_v15 = vadd.f32 %v1552_v56, %v458_v13  ;;  %v723_v16 = vadd.f32 %v1552_v56, %v538_v14 }
 0x15b   : > { %740 = vst [vmem:[%s1560_s24 + $0x28] sm:$0xff] %v708_v11  ;;  %756 = vst [vmem:[%s1560_s24 + $0xa8] sm:$0xff] %v724_v12 }
 0x15c   : > { %739 = vst [vmem:[%s1560_s24 + $0x20] sm:$0xff] %v707_v15  ;;  %755 = vst [vmem:[%s1560_s24 + $0xa0] sm:$0xff] %v723_v16  ;;  %v1008_v17 = vpop.f32.mrb[6].mxu0  ;;  %v1032_v18 = vpop.f32.mrb[6].mxu1 }
 0x15d   : > { %v710_v19 = vadd.f32 %v1008_v17, %v1552_v56  ;;  %v726_v20 = vadd.f32 %v1032_v18, %v1552_v56  ;;  %v468_v21 = vpop.f32.mrb[7].mxu0  ;;  %v548_v22 = vpop.f32.mrb[7].mxu1 }
 0x15e   : > { %v709_v23 = vadd.f32 %v1552_v56, %v468_v21  ;;  %v725_v24 = vadd.f32 %v1552_v56, %v548_v22 }
 0x15f   : > { %742 = vst [vmem:[%s1560_s24 + $0x38] sm:$0xff] %v710_v19  ;;  %758 = vst [vmem:[%s1560_s24 + $0xb8] sm:$0xff] %v726_v20 }
 0x160   : > { %741 = vst [vmem:[%s1560_s24 + $0x30] sm:$0xff] %v709_v23  ;;  %757 = vst [vmem:[%s1560_s24 + $0xb0] sm:$0xff] %v725_v24  ;;  %v1011_v25 = vpop.f32.mrb[8].mxu0  ;;  %v1035_v26 = vpop.f32.mrb[8].mxu1 }
 0x161   : > { %v712_v27 = vadd.f32 %v1011_v25, %v1552_v56  ;;  %v728_v28 = vadd.f32 %v1035_v26, %v1552_v56  ;;  %v478_v29 = vpop.f32.mrb[9].mxu0  ;;  %v558_v30 = vpop.f32.mrb[9].mxu1 }
 0x162   : > { %v711_v31 = vadd.f32 %v1552_v56, %v478_v29  ;;  %v727_v32 = vadd.f32 %v1552_v56, %v558_v30 }
 0x163   : > { %744 = vst [vmem:[%s1560_s24 + $0x48] sm:$0xff] %v712_v27  ;;  %760 = vst [vmem:[%s1560_s24 + $0xc8] sm:$0xff] %v728_v28 }
 0x164   : > { %743 = vst [vmem:[%s1560_s24 + $0x40] sm:$0xff] %v711_v31  ;;  %759 = vst [vmem:[%s1560_s24 + $0xc0] sm:$0xff] %v727_v32  ;;  %v1014_v33 = vpop.f32.mrb[10].mxu0  ;;  %v1038_v34 = vpop.f32.mrb[10].mxu1 }
 0x165   : > { %v714_v35 = vadd.f32 %v1014_v33, %v1552_v56  ;;  %v730_v36 = vadd.f32 %v1038_v34, %v1552_v56  ;;  %v488_v37 = vpop.f32.mrb[11].mxu0  ;;  %v568_v38 = vpop.f32.mrb[11].mxu1 }
 0x166   : > { %v713_v39 = vadd.f32 %v1552_v56, %v488_v37  ;;  %v729_v40 = vadd.f32 %v1552_v56, %v568_v38 }
 0x167   : > { %746 = vst [vmem:[%s1560_s24 + $0x58] sm:$0xff] %v714_v35  ;;  %762 = vst [vmem:[%s1560_s24 + $0xd8] sm:$0xff] %v730_v36 }
 0x168   : > { %745 = vst [vmem:[%s1560_s24 + $0x50] sm:$0xff] %v713_v39  ;;  %761 = vst [vmem:[%s1560_s24 + $0xd0] sm:$0xff] %v729_v40  ;;  %v1017_v41 = vpop.f32.mrb[12].mxu0  ;;  %v1041_v42 = vpop.f32.mrb[12].mxu1 }
 0x169   : > { %v716_v43 = vadd.f32 %v1017_v41, %v1552_v56  ;;  %v732_v44 = vadd.f32 %v1041_v42, %v1552_v56  ;;  %v498_v45 = vpop.f32.mrb[13].mxu0  ;;  %v578_v46 = vpop.f32.mrb[13].mxu1 }
 0x16a   : > { %v715_v47 = vadd.f32 %v1552_v56, %v498_v45  ;;  %v731_v48 = vadd.f32 %v1552_v56, %v578_v46 }
 0x16b   : > { %748 = vst [vmem:[%s1560_s24 + $0x68] sm:$0xff] %v716_v43  ;;  %764 = vst [vmem:[%s1560_s24 + $0xe8] sm:$0xff] %v732_v44 }
 0x16c   : > { %747 = vst [vmem:[%s1560_s24 + $0x60] sm:$0xff] %v715_v47  ;;  %763 = vst [vmem:[%s1560_s24 + $0xe0] sm:$0xff] %v731_v48  ;;  %v1020_v49 = vpop.f32.mrb[14].mxu0  ;;  %v1044_v50 = vpop.f32.mrb[14].mxu1 }
 0x16d   : > { %v718_v51 = vadd.f32 %v1020_v49, %v1552_v56  ;;  %v734_v52 = vadd.f32 %v1044_v50, %v1552_v56  ;;  %v508_v53 = vpop.f32.mrb[15].mxu0  ;;  %v588_v54 = vpop.f32.mrb[15].mxu1 }
 0x16e   : > { %v717_v55 = vadd.f32 %v1552_v56, %v508_v53  ;;  %v733_v57 = vadd.f32 %v1552_v56, %v588_v54 }
 0x16f   : > { %750 = vst [vmem:[%s1560_s24 + $0x78] sm:$0xff] %v718_v51  ;;  %766 = vst [vmem:[%s1560_s24 + $0xf8] sm:$0xff] %v734_v52 }
 0x170   : > { %749 = vst [vmem:[%s1560_s24 + $0x70] sm:$0xff] %v717_v55  ;;  %765 = vst [vmem:[%s1560_s24 + $0xf0] sm:$0xff] %v733_v57 }
 0x171   : > { %1241 = shalt.err (!%p1238_p5)
}
 0x172   : > { %s1242_s6 = scalar_lea.hbm %s1621_s18, 4096  ;;  %s1246_s19 = scalar_lea.hbm %s1681_s3, 8192 }
 0x173   : > { %p1243_p9 = scmp.ne.s32.totalorder %s1621_s18, %s1242_s6  ;;  %p1247_p3 = scmp.lt.u32.totalorder %s1621_s18, %s1681_s3 }
 0x174   : > { %p1248_p7 = scmp.lt.u32.totalorder %s1246_s19, %s1242_s6  ;;  %p1250_p4 = scmp.lt.u32.totalorder %s1242_s6, %s1621_s18 }
 0x175   : > { %p1244_p1 = pnand %p1243_p9, %p1442_p10 }
 0x176   : > { %p1249_p13 = por %p1248_p7, %p1247_p3 }
 0x177   : > { %p1245_p2 = pneg %p1244_p1 }
 0x178   : > { %p1251_p6 = por %p1250_p4, %p1249_p13 }
 0x17a   : > { %p1252_p8 = pnand %p1251_p6, %p1245_p2 }
 0x17c   : > { %1255 = shalt.err (!%p1252_p8)
}
 0x17d   : > { %s1321_s24 = smov 128   ;;  %s1322_s10 = smov 8  }
 0x17e   : > { %1099 = dma.vmem_to_hbm [thread:$0]  (%p1442_p10), %s1623_s11, 4096, %s1621_s18, %s768_s25, %s1321_s24, %s1321_s24, %s1322_s10  }
 0x17f PF: > { %s797_s15 = sand.u32 1, %s1294_s12   ;;  %p1699_p12 = scmp.ne.s32.totalorder %s1689_s23, 0 }
 0x180   : > { %p1700_p11 = scmp.ge.s32.totalorder %s1314_s17, 2  ;;  %s798_s9 = scalar_lea.sflag [#allocation5], %s797_s15 }
 0x182   : > { %p1110_p0 = pnand %p1700_p11, %p1699_p12 }
 0x184   : > { %1289 = dma.done.wait (!%p1110_p0), %s798_s9, 4096  }
 0x185   : > { %1291 = vsyncadd (!%p1110_p0), %s798_s9, 4294963200  ;;  %s20_s17 = sadd.s32 1, %s1314_s17   ;;  %s1701_s12 = smov %s1298_s13 }
 0x186   : > { %p17_p5 = scmp.ge.s32.totalorder %s20_s17, 4   ;;  %s1702_s13 = smov %s1302_s14 }
 0x187   : > { %s1703_s14 = smov %s1451_s5  ;;  %s1704_s15 = smov %s1310_s16 }
 0x188   : > { %s1705_s16 = smov %s1707_s28  ;;  %19 = sbr.rel (!%p17_p5) target bundleno = 7 (0x7), region = 93 }
 0x18f   :  { %803 = vsyncpa [#allocation4], 1 }
 0x190   :  { %805 = vsyncpa [#allocation4 + $0x1], 1 }
 0x191   :  { %806 = vsyncpa [#allocation7], 1 }
 0x192   :  { %807 = vsyncpa [#allocation5], 1 }
 0x193   :  { %809 = vsyncpa [#allocation5 + $0x1], 1 }

</bundles_post_ra>
